<compile_context>
chip_gen: v5e
topology: v5e:2x2
jax: 0.10.0
libtpu: 0.0.40
codegen_flags: <defaults>
</compile_context>

<pallas_src>
import math

import jax
import jax.numpy as jnp
from jax.experimental import pallas as pl
from jax.experimental.pallas import tpu as pltpu

_SMALL_INPUT_BYTES = 256 * 1024  # below this, plain JAX beats any Pallas launch


def _pos_enc_kernel(x_ref, pe_ref, o_ref):
    # x_ref: (ts, B*D) tile, pe_ref: (1, B*D) pre-scaled pe row, o_ref: (ts, B*D)
    o_ref[...] = x_ref[...] + pe_ref[...]


def build_pe_table(d_model: int, max_len: int = 5000, dtype=jnp.float32):
    """Deterministic replica of the buffer registered in __init__ (squeezed to 2D)."""
    position = jnp.arange(max_len, dtype=jnp.float32)[:, None]          # [max_len, 1]
    div_term = jnp.exp(
        jnp.arange(0, d_model, 2, dtype=jnp.float32)
        * (-math.log(10000.0) / d_model)
    )                                                                    # [d_model/2]
    pe = jnp.zeros((max_len + 1, d_model), dtype=jnp.float32)
    pe = pe.at[1:, 0::2].set(jnp.sin(position * div_term))
    pe = pe.at[1:, 1::2].set(jnp.cos(position * div_term))
    return pe.astype(dtype)


def _choose_seq_tile(S: int, bytes_per_row: int, itemsize: int) -> int:
    """Pick a seq tile: ~2 MiB per tile, sublane-packing aligned, >= 8 grid steps
    when the seq length allows (pipelining + v7x megacore sharding)."""
    sub = max(8, 32 // max(itemsize, 1))       # 8 (f32), 16 (bf16), 32 (int8)
    target_bytes = 2 << 20
    ts = max(sub, (int(target_bytes // max(bytes_per_row, 1)) // sub) * sub)
    while ts > sub and pl.cdiv(S, ts) < 8:
        ts = max(sub, ((ts // 2) // sub) * sub)
        if ts == sub:
            break
    if ts >= S:
        ts = S  # full-extent block is always layout-legal
    return ts


def positional_encoding_forward(x, pe_table, *, force_pallas: bool = False):
    """
    Args:
      x:        [seq_len, batch, d_model]
      pe_table: [max_len + 1, d_model] buffer from build_pe_table (f32)
    Returns:
      [seq_len, batch, d_model]
    """
    S, B, D = x.shape
    itemsize = jnp.dtype(x.dtype).itemsize

    # Reproduces `self.pe[:x.shape[0], 0, :] * 0.01` where x.shape[0] == batch
    # after the permute. Scale in f32 first, then cast to x.dtype (accuracy).
    pe_slice = (pe_table[:B, :].astype(jnp.float32) * 0.01).astype(x.dtype)  # [B, D]

    # TODO(synk): nn.Dropout(p=0.1) has no eval-mode effect; modeled as identity.

    total_bytes = S * B * D * itemsize
    if total_bytes < _SMALL_INPUT_BYTES and not force_pallas:
        # KB-scale input: let XLA fuse the add; Pallas launch overhead dominates.
        return x + pe_slice[None, :, :]

    # Lane-dense flatten: pe depends only on (b, d), so broadcasting over the
    # seq axis is unchanged by collapsing (b, d) into one trailing dim.
    # (For best performance B*D should be a multiple of 128; smaller / unaligned
    # trailing dims still run correctly via masked stores.)
    BD = B * D
    x2 = x.reshape(S, BD)
    pe2 = pe_slice.reshape(1, BD)

    ts = _choose_seq_tile(S, BD * itemsize, itemsize)
    grid = (pl.cdiv(S, ts),)

    # Scoped VMEM: double-buffered input + output tiles + pe row + headroom,
    # clamped well under the 64 MiB per-TC budget of v7x.
    tile_bytes = ts * BD * itemsize
    pe_bytes = BD * itemsize
    vmem_need = 2 * 2 * tile_bytes + 2 * pe_bytes + (4 << 20)
    vmem_limit = int(min(48 << 20, max(16 << 20, vmem_need)))

    out2 = pl.pallas_call(
        _pos_enc_kernel,
        out_shape=jax.ShapeDtypeStruct((S, BD), x.dtype),
        grid_spec=pltpu.PrefetchScalarGridSpec(
            num_scalar_prefetch=0,
            grid=grid,
            in_specs=[
                pl.BlockSpec((ts, BD), lambda i: (i, 0)),
                pl.BlockSpec((1, BD), lambda i: (0, 0)),
            ],
            out_specs=pl.BlockSpec((ts, BD), lambda i: (i, 0)),
        ),
        compiler_params=pltpu.CompilerParams(
            dimension_semantics=("parallel",),
            vmem_limit_bytes=vmem_limit,
        ),
    )(x2, pe2)
    return out2.reshape(S, B, D)


if __name__ == "__main__":
    # --- Small shape consistent with the module: [seq_len, batch, d_model] ---
    seq_len, batch, d_model = 8, 2, 32
    key = jax.random.PRNGKey(0)
    x_small = jax.random.normal(key, (seq_len, batch, d_model), dtype=jnp.float32)
    pe_table = build_pe_table(d_model, max_len=5000)
    ref_small = x_small + (pe_table[:batch, :] * 0.01)[None, :, :]

    # 1) Default path: tiny input -> plain-JAX fallback.
    out_small = jax.block_until_ready(positional_encoding_forward(x_small, pe_table))
    assert out_small.shape == (seq_len, batch, d_model)
    assert jnp.allclose(out_small, ref_small, atol=1e-6, rtol=1e-6)

    # 2) Same tiny shape forced through the Pallas kernel (single full block).
    out_small_pl = jax.block_until_ready(
        positional_encoding_forward(x_small, pe_table, force_pallas=True)
    )
    assert jnp.allclose(out_small_pl, ref_small, atol=1e-6, rtol=1e-6)

    # 3) Moderate shape exercising the tiled, lane-dense, multi-step-grid path.
    S2, B2, D2 = 256, 4, 128
    x_big = jax.random.normal(jax.random.PRNGKey(0), (S2, B2, D2), dtype=jnp.float32)
    pe_table_big = build_pe_table(D2, max_len=5000)
    out_big = jax.block_until_ready(positional_encoding_forward(x_big, pe_table_big))
    ref_big = x_big + (pe_table_big[:B2, :] * 0.01)[None, :, :]
    assert out_big.shape == (S2, B2, D2)
    assert jnp.allclose(out_big, ref_big, atol=1e-6, rtol=1e-6)

    print("KERNEL_OK")
</pallas_src>

<mosaic_0001>
module attributes {stable_mosaic.version = 11 : i64} {
  func.func @_pos_enc_kernel(%arg0: i32, %arg1: memref<8x64xf32, #tpu.memory_space<vmem>>, %arg2: memref<1x64xf32, #tpu.memory_space<vmem>>, %arg3: memref<8x64xf32, #tpu.memory_space<vmem>>) attributes {dimension_semantics = [#tpu.dimension_semantics<parallel>], iteration_bounds = array<i64: 1>, scalar_prefetch = 0 : i64, scratch_operands = 0 : i64, tpu.core_type = #tpu.core_type<tc>, window_params = [{transform_indices = @transform_0, window_bounds = array<i64: 8, 64>}, {pipeline_mode = #tpu.pipeline_mode<synchronous>, transform_indices = @transform_1, window_bounds = array<i64: 1, 64>}, {transform_indices = @transform_2, window_bounds = array<i64: 8, 64>}]} {
    %c0 = arith.constant 0 : index
    %c0_0 = arith.constant 0 : index
    %0 = vector.load %arg1[%c0, %c0_0] : memref<8x64xf32, #tpu.memory_space<vmem>>, vector<8x64xf32>
    %c0_1 = arith.constant 0 : index
    %c0_2 = arith.constant 0 : index
    %1 = vector.load %arg2[%c0_1, %c0_2] : memref<1x64xf32, #tpu.memory_space<vmem>>, vector<1x64xf32>
    %2 = vector.broadcast %1 : vector<1x64xf32> to vector<8x64xf32>
    %3 = arith.addf %0, %2 : vector<8x64xf32>
    %c0_3 = arith.constant 0 : index
    %c0_4 = arith.constant 0 : index
    %4 = vector.load %arg3[%c0_3, %c0_4] : memref<8x64xf32, #tpu.memory_space<vmem>>, vector<8x64xf32>
    tpu.vector_store %arg3[%c0_3, %c0_4], %3 {strides = array<i32>} : memref<8x64xf32, #tpu.memory_space<vmem>>, vector<8x64xf32>,
    return
  }
  func.func @transform_0(%arg0: i32) -> (i32, i32) {
    %c0_i32 = arith.constant 0 : i32
    %c0_i32_0 = arith.constant 0 : i32
    return %arg0, %c0_i32 : i32, i32
  }
  func.func @transform_1(%arg0: i32) -> (i32, i32) {
    %c0_i32 = arith.constant 0 : i32
    %c0_i32_0 = arith.constant 0 : i32
    %c0_i32_1 = arith.constant 0 : i32
    return %c0_i32, %c0_i32_0 : i32, i32
  }
  func.func @transform_2(%arg0: i32) -> (i32, i32) {
    %c0_i32 = arith.constant 0 : i32
    %c0_i32_0 = arith.constant 0 : i32
    return %arg0, %c0_i32 : i32, i32
  }
}

</mosaic_0001>

<bundles_post_ra>
// kernel: tpu_custom_call.1
= control target key start
LH: loop header
LB: loop body
LE: loop exit
PB: predicated region body
PF: predicated region fallthrough
CT: control target
= control target key end

     0   :  { %7 = vsyncpa [#allocation3], 0  ;;  %s175_s0 = inlined_call_operand.hbm [shape: f32[8,64], index: 0, kind: input, shape index: {}]   ;;  %s176_s1 = inlined_call_operand.hbm [shape: f32[1,64], index: 1, kind: input, shape index: {}]   ;;  %s177_s2 = inlined_call_operand.hbm [shape: f32[8,64], index: 2, kind: output, shape index: {}]  }
   0x1   :  { %8 = vsyncpa [#allocation6], 0 }
   0x2   :  { %9 = vsyncpa [#allocation4], 0  ;;  %s15_s11 = sshll.u32 %s175_s0, 4  ;;  %s148_s12 = smov [#allocation2]   ;;  %s16_s11 = int_to_ptr.hbm [resolvable:$true] %s15_s11 }
   0x3   :  { %s17_s13 = sshll.u32 %s148_s12, 4  ;;  %s26_s16 = sshll.u32 %s176_s1, 4  ;;  %s18_s13 = int_to_ptr.vmem [resolvable:$true] %s17_s13  ;;  %s27_s16 = int_to_ptr.hbm [resolvable:$true] %s26_s16 }
   0x4   :  { %20 = dma.hbm_to_vmem [thread:$0]  %s16_s11, 128, %s18_s13, [#allocation3]  }
   0x5   :  { %s149_s17 = smov [#allocation5]  }
   0x6   :  { %s28_s18 = sshll.u32 %s149_s17, 4  ;;  %s29_s18 = int_to_ptr.vmem [resolvable:$true] %s28_s18 }
   0x7   :  { %31 = dma.hbm_to_vmem [thread:$0]  %s27_s16, 16, %s29_s18, [#allocation6]  }
   0x8   :  { %142 = dma.done.wait [#allocation3], 128  }
   0x9   :  { %143 = vsyncadd [#allocation3], 4294967168 }
   0xa   :  { %144 = dma.done.wait [#allocation6], 16  }
   0xb   :  { %145 = vsyncadd [#allocation6], 4294967280  ;;  %s150_s19 = smov [#allocation7]   ;;  %s55_s22 = sshll.u32 %s177_s2, 4  ;;  %v40_v0 = vld [vmem:[#allocation2] sm:$0xff]  ;;  %vm46_vm0 = vcmask 523264   ;;  %s56_s22 = int_to_ptr.hbm [resolvable:$true] %s55_s22 }
   0xc   :  { %s53_s0 = sshll.u32 %s150_s19, 4  ;;  %v69_v1 = vld [vmem:[#allocation5] ss:$0 sm:$0xff]  ;;  %s54_s0 = int_to_ptr.vmem [resolvable:$true] %s53_s0 }
   0xd   :  { %v45_v2 = vadd.f32 %v69_v1, %v40_v0 }
   0xf   :  { %47 = vst.msk [vmem:[#allocation7] sm:$0xff] %vm46_vm0, %v45_v2 }
  0x10   :  { %58 = dma.vmem_to_hbm [thread:$0]  %s54_s0, 128, %s56_s22, [#allocation4]  }
  0x11   :  { %146 = dma.done.wait [#allocation4], 128  }
  0x12   :  { %147 = vsyncadd [#allocation4], 4294967168 }
  0x13   :  { %63 = vsyncpa [#allocation3], 1 }
  0x14   :  { %64 = vsyncpa [#allocation6], 1 }
  0x15   :  { %65 = vsyncpa [#allocation4], 1 }

</bundles_post_ra>
